<compile_context>
chip_gen: v5e
topology: v5e:2x2
jax: 0.10.0
libtpu: 0.0.40
codegen_flags: <defaults>
</compile_context>

<pallas_src>
import functools

import jax
import jax.numpy as jnp
from jax.experimental import pallas as pl
from jax.experimental.pallas import tpu as pltpu


def _res_layer_kernel(x_ref, a1_ref, b1_ref, a2_ref, b2_ref, csum_ref, cexp_ref,
                      out_ref, xpad_ref, *, TB, H, W, NL, K, pad, eps, cdtype):
    """One grid step == TB lane-packed groups (each group = P images side by side on lanes).

    x_ref    : (TB, H, NL)      f32   activations, NL = P*W*C fused on lanes
    a*_ref   : (K, NL, NL)      cdtype  per-row-tap width-banded, block-diag conv weights
    b*_ref   : (1, NL)          f32   bias tiled across P*W
    csum_ref : (NL, P*C)        f32   0/1 matrix: per-(image-in-pair, channel) lane sum
    cexp_ref : (P*C, NL)        f32   0/1 matrix: broadcast back to NL lanes
    out_ref  : (TB, H, NL)      f32
    xpad_ref : (TB, H+2*pad, NL) f32  VMEM scratch, height-zero-padded activations
    """
    inv_n = 1.0 / float(H * W)

    def conv_in_relu(a_ref, b_ref):
        # K accumulating MXU matmuls, one per vertical tap.  Width taps and width
        # zero-padding are folded into the banded block-diagonal weight a_ref[kh].
        y = jnp.zeros((TB * H, NL), jnp.float32)
        for kh in range(K):
            op = xpad_ref[:, kh:kh + H, :].reshape(TB * H, NL).astype(cdtype)
            y = y + jnp.dot(op, a_ref[kh], preferred_element_type=jnp.float32)
        y = y + b_ref[...]                                              # (TB*H, NL) f32

        # InstanceNorm2d defaults: affine=False, eps=1e-5, biased variance, statistics per
        # image and channel over the spatial dims.
        y3 = y.reshape(TB, H, NL)
        rs = jnp.sum(y3, axis=1)                                        # (TB, NL)
        rs2 = jnp.sum(y3 * y3, axis=1)                                  # (TB, NL)
        mean = jnp.dot(rs, csum_ref[...],
                       preferred_element_type=jnp.float32) * inv_n      # (TB, P*C)
        ex2 = jnp.dot(rs2, csum_ref[...],
                      preferred_element_type=jnp.float32) * inv_n       # (TB, P*C)
        var = jnp.maximum(ex2 - mean * mean, 0.0)   # clamp: single-pass var can go < 0
        istd = jax.lax.rsqrt(var + eps)                                 # (TB, P*C)
        mean_b = jnp.dot(mean, cexp_ref[...],
                         preferred_element_type=jnp.float32)            # (TB, NL)
        istd_b = jnp.dot(istd, cexp_ref[...],
                         preferred_element_type=jnp.float32)            # (TB, NL)
        yn = (y3 - mean_b[:, None, :]) * istd_b[:, None, :]
        return jnp.maximum(yn, 0.0)                                     # (TB, H, NL) f32

    # Zero the height-padded scratch once per step; only the interior rows are written
    # below, so the zero border rows stay valid for BOTH convs (Cout == Cin here).
    xpad_ref[...] = jnp.zeros(xpad_ref.shape, xpad_ref.dtype)

    x = x_ref[...]                                                      # (TB, H, NL) f32

    # ---- ConvLayer 1 ----
    xpad_ref[:, pad:pad + H, :] = x
    y1 = conv_in_relu(a1_ref, b1_ref)

    # ---- ConvLayer 2 (reuse the same padded scratch; border rows are still zero) ----
    xpad_ref[:, pad:pad + H, :] = y1
    y2 = conv_in_relu(a2_ref, b2_ref)

    # ---- residual add (f32) ----
    out_ref[...] = (y2 + x).astype(out_ref.dtype)


def _tap_weights(w_hwio, W, pad, P, compute_dtype):
    """(K, K, Cin, Cout) HWIO -> (K, P*W*Cin, P*W*Cout) per-row-tap weights.

    For tap kh, B_kh[u*Cin + ci, w*Cout + co] = w_hwio[kh, u - w + pad, ci, co] when
    0 <= u - w + pad < K else 0, so that (unpadded row of x) @ B_kh implements the width
    taps AND the width zero-padding of a 'same' cross-correlation.  The P lane-packed
    images get a block-diagonal copy so they never mix."""
    K, _, Cin, Cout = w_hwio.shape
    u = jnp.arange(W)[:, None]                     # input-width index   (W, 1)
    w = jnp.arange(W)[None, :]                     # output-width index  (1, W)
    kw = u - w + pad                               # width tap index     (W, W)
    valid = (kw >= 0) & (kw < K)
    kw_safe = jnp.clip(kw, 0, K - 1)
    g = w_hwio[:, kw_safe, :, :]                   # (K, W, W, Cin, Cout)
    g = jnp.where(valid[None, :, :, None, None], g, 0.0)
    band = jnp.transpose(g, (0, 1, 3, 2, 4)).reshape(K, W * Cin, W * Cout)
    eye_p = jnp.eye(P, dtype=band.dtype)
    blk = jnp.einsum('pq,kab->kpaqb', eye_p, band)
    return blk.reshape(K, P * W * Cin, P * W * Cout).astype(compute_dtype)


def res_layer_pallas(x_nchw, w1, b1, w2, b2, *, kernel_size,
                     compute_dtype=jnp.bfloat16):
    """x_nchw: (B, C, H, W) f32; w*: (K, K, Cin, Cout) HWIO; b*: (Cout,). stride == 1."""
    K = kernel_size
    assert K % 2 == 1, "ZeroPad2d(K//2) + Conv2d only gives 'same' output for odd K"
    pad = K // 2
    B, C, H, W = x_nchw.shape
    assert w1.shape == (K, K, C, C) and w2.shape == (K, K, C, C), \
        "residual layer requires in_ch == out_ch"
    WC = W * C

    # ---- batching geometry ----
    # P images packed side-by-side on lanes so NL is a multiple of 128 (unmasked stores,
    # full MXU N-dim).  TB lane-packed groups per grid step so M = TB*H ~ 128.
    P = (128 // WC) if (WC < 128 and 128 % WC == 0) else 1
    NL = P * WC
    G = -(-B // P)                         # number of lane-packed groups
    TB = min(max(1, 128 // H), G)
    if G >= 2:
        TB = min(TB, -(-G // 2))           # keep >= 2 grid steps (both v7x TensorCores)
    n_steps = -(-G // TB)
    BP = n_steps * TB * P                  # zero-padded batch

    # ---- NCHW -> lane-packed (groups, H, NL), residual stays f32 ----
    x = jnp.transpose(x_nchw, (0, 2, 3, 1)).reshape(B, H, WC).astype(jnp.float32)
    if BP > B:
        x = jnp.concatenate([x, jnp.zeros((BP - B, H, WC), jnp.float32)], axis=0)
    xg = x.reshape(n_steps * TB, P, H, WC).transpose(0, 2, 1, 3)
    xg = xg.reshape(n_steps * TB, H, NL)

    # ---- constants ----
    a1 = _tap_weights(w1, W, pad, P, compute_dtype)                     # (K, NL, NL)
    a2 = _tap_weights(w2, W, pad, P, compute_dtype)
    b1t = jnp.tile(b1.astype(jnp.float32), P * W).reshape(1, NL)
    b2t = jnp.tile(b2.astype(jnp.float32), P * W).reshape(1, NL)
    base = jnp.tile(jnp.eye(C, dtype=jnp.float32), (W, 1))              # (W*C, C)
    csum = jnp.einsum('pq,ac->paqc', jnp.eye(P, dtype=jnp.float32), base)
    csum = csum.reshape(NL, P * C)                                      # (NL, P*C)
    cexp = jnp.transpose(csum)                                          # (P*C, NL)

    kernel = functools.partial(_res_layer_kernel, TB=TB, H=H, W=W, NL=NL, K=K,
                               pad=pad, eps=1e-5, cdtype=compute_dtype)

    out = pl.pallas_call(
        kernel,
        out_shape=jax.ShapeDtypeStruct((n_steps * TB, H, NL), jnp.float32),
        grid_spec=pltpu.PrefetchScalarGridSpec(
            num_scalar_prefetch=0,
            grid=(n_steps,),
            in_specs=[
                pl.BlockSpec((TB, H, NL), lambda s: (s, 0, 0)),         # activations
                pl.BlockSpec((K, NL, NL), lambda s: (0, 0, 0)),         # conv1 tap weights
                pl.BlockSpec((1, NL), lambda s: (0, 0)),                # conv1 bias
                pl.BlockSpec((K, NL, NL), lambda s: (0, 0, 0)),         # conv2 tap weights
                pl.BlockSpec((1, NL), lambda s: (0, 0)),                # conv2 bias
                pl.BlockSpec((NL, P * C), lambda s: (0, 0)),            # channel-sum matrix
                pl.BlockSpec((P * C, NL), lambda s: (0, 0)),            # channel-expand matrix
            ],
            out_specs=pl.BlockSpec((TB, H, NL), lambda s: (s, 0, 0)),
            scratch_shapes=[pltpu.VMEM((TB, H + 2 * pad, NL), jnp.float32)],
        ),
        compiler_params=pltpu.CompilerParams(
            dimension_semantics=("parallel",),      # batch-group axis feeds both TCs
        ),
    )(xg, a1, b1t, a2, b2t, csum, cexp)

    out = out.reshape(n_steps * TB, H, P, WC).transpose(0, 2, 1, 3).reshape(BP, H, WC)
    out = out[:B].reshape(B, H, W, C)
    return jnp.transpose(out, (0, 3, 1, 2))                             # -> NCHW


# ---------------- pure-JAX references (for correctness checks) ----------------
def _conv_layer_ref(x_nhwc, w_hwio, b, kernel_size, compute_dtype):
    pad = kernel_size // 2
    y = jax.lax.conv_general_dilated(
        x_nhwc.astype(compute_dtype), w_hwio.astype(compute_dtype),
        window_strides=(1, 1), padding=[(pad, pad), (pad, pad)],
        dimension_numbers=("NHWC", "HWIO", "NHWC"),
        preferred_element_type=jnp.float32) + b.astype(jnp.float32)
    mean = y.mean(axis=(1, 2), keepdims=True)
    var = ((y - mean) ** 2).mean(axis=(1, 2), keepdims=True)
    return jnp.maximum((y - mean) * jax.lax.rsqrt(var + 1e-5), 0.0)


def _res_layer_ref(x_nchw, w1, b1, w2, b2, kernel_size, compute_dtype=jnp.float32):
    x = jnp.transpose(x_nchw, (0, 2, 3, 1)).astype(jnp.float32)
    y = _conv_layer_ref(x, w1, b1, kernel_size, compute_dtype)
    y = _conv_layer_ref(y, w2, b2, kernel_size, compute_dtype) + x
    return jnp.transpose(y, (0, 3, 1, 2))


if __name__ == "__main__":
    # Shapes consistent with the module (residual requires in_ch == out_ch, stride == 1).
    B, C, H, W, K = 2, 4, 16, 16, 3

    key = jax.random.PRNGKey(0)
    kx, kw1, kb1, kw2, kb2 = jax.random.split(key, 5)

    x = jax.random.normal(kx, (B, C, H, W), dtype=jnp.float32)
    # Conv parameters stored as HWIO = (K, K, Cin, Cout); biases (Cout,).
    w1 = 0.1 * jax.random.normal(kw1, (K, K, C, C), dtype=jnp.float32)
    b1 = 0.1 * jax.random.normal(kb1, (C,), dtype=jnp.float32)
    w2 = 0.1 * jax.random.normal(kw2, (K, K, C, C), dtype=jnp.float32)
    b2 = 0.1 * jax.random.normal(kb2, (C,), dtype=jnp.float32)

    # 1) Exact module semantics: f32 MXU path vs pure-JAX f32 reference.
    out_f32 = jax.block_until_ready(
        res_layer_pallas(x, w1, b1, w2, b2, kernel_size=K, compute_dtype=jnp.float32))
    ref_f32 = jax.block_until_ready(_res_layer_ref(x, w1, b1, w2, b2, K, jnp.float32))
    assert out_f32.shape == (B, C, H, W)
    assert jnp.allclose(out_f32, ref_f32, atol=1e-2, rtol=1e-2), "f32 kernel mismatch"

    # 2) Optimized default path (bf16 MXU operands, f32 accumulation) vs matched ref.
    out_bf16 = jax.block_until_ready(res_layer_pallas(x, w1, b1, w2, b2, kernel_size=K))
    ref_bf16 = jax.block_until_ready(_res_layer_ref(x, w1, b1, w2, b2, K, jnp.bfloat16))
    assert out_bf16.shape == (B, C, H, W)
    assert jnp.allclose(out_bf16, ref_bf16, atol=1e-2, rtol=1e-2), "bf16 kernel mismatch"

    # 3) Odd batch exercises the zero-padding / multi-step ("parallel") grid path.
    x3 = jax.random.normal(kx, (3, C, H, W), dtype=jnp.float32)
    out3 = jax.block_until_ready(
        res_layer_pallas(x3, w1, b1, w2, b2, kernel_size=K, compute_dtype=jnp.float32))
    ref3 = jax.block_until_ready(_res_layer_ref(x3, w1, b1, w2, b2, K, jnp.float32))
    assert out3.shape == (3, C, H, W)
    assert jnp.allclose(out3, ref3, atol=1e-2, rtol=1e-2), "odd-batch kernel mismatch"

    print("KERNEL_OK")
</pallas_src>

<mosaic_0001>
module attributes {stable_mosaic.version = 11 : i64} {
  func.func @_res_layer_kernel(%arg0: i32, %arg1: memref<1x16x128xf32, #tpu.memory_space<vmem>>, %arg2: memref<3x128x128xf32, #tpu.memory_space<vmem>>, %arg3: memref<1x128xf32, #tpu.memory_space<vmem>>, %arg4: memref<3x128x128xf32, #tpu.memory_space<vmem>>, %arg5: memref<1x128xf32, #tpu.memory_space<vmem>>, %arg6: memref<128x8xf32, #tpu.memory_space<vmem>>, %arg7: memref<8x128xf32, #tpu.memory_space<vmem>>, %arg8: memref<1x16x128xf32, #tpu.memory_space<vmem>>, %arg9: memref<1x18x128xf32, #tpu.memory_space<vmem>>) attributes {dimension_semantics = [#tpu.dimension_semantics<parallel>], iteration_bounds = array<i64: 1>, scalar_prefetch = 0 : i64, scratch_operands = 1 : i64, tpu.core_type = #tpu.core_type<tc>, window_params = [{transform_indices = @transform_0, window_bounds = array<i64: 1, 16, 128>}, {pipeline_mode = #tpu.pipeline_mode<synchronous>, transform_indices = @transform_1, window_bounds = array<i64: 3, 128, 128>}, {pipeline_mode = #tpu.pipeline_mode<synchronous>, transform_indices = @transform_2, window_bounds = array<i64: 1, 128>}, {pipeline_mode = #tpu.pipeline_mode<synchronous>, transform_indices = @transform_3, window_bounds = array<i64: 3, 128, 128>}, {pipeline_mode = #tpu.pipeline_mode<synchronous>, transform_indices = @transform_4, window_bounds = array<i64: 1, 128>}, {pipeline_mode = #tpu.pipeline_mode<synchronous>, transform_indices = @transform_5, window_bounds = array<i64: 128, 8>}, {pipeline_mode = #tpu.pipeline_mode<synchronous>, transform_indices = @transform_6, window_bounds = array<i64: 8, 128>}, {transform_indices = @transform_7, window_bounds = array<i64: 1, 16, 128>}]} {
    %cst = arith.constant 0.000000e+00 : f32
    %0 = vector.broadcast %cst : f32 to vector<1x18x128xf32>
    %c0 = arith.constant 0 : index
    %c0_0 = arith.constant 0 : index
    %c0_1 = arith.constant 0 : index
    %1 = vector.load %arg9[%c0, %c0_0, %c0_1] : memref<1x18x128xf32, #tpu.memory_space<vmem>>, vector<1x18x128xf32>
    tpu.vector_store %arg9[%c0, %c0_0, %c0_1], %0 {strides = array<i32>} : memref<1x18x128xf32, #tpu.memory_space<vmem>>, vector<1x18x128xf32>,
    %c0_2 = arith.constant 0 : index
    %c0_3 = arith.constant 0 : index
    %c0_4 = arith.constant 0 : index
    %2 = vector.load %arg1[%c0_2, %c0_3, %c0_4] : memref<1x16x128xf32, #tpu.memory_space<vmem>>, vector<1x16x128xf32>
    %c0_5 = arith.constant 0 : index
    %c1 = arith.constant 1 : index
    %c0_6 = arith.constant 0 : index
    %3 = vector.load %arg9[%c0_5, %c1, %c0_6] : memref<1x18x128xf32, #tpu.memory_space<vmem>>, vector<1x16x128xf32>
    tpu.vector_store %arg9[%c0_5, %c1, %c0_6], %2 {strides = array<i32>} : memref<1x18x128xf32, #tpu.memory_space<vmem>>, vector<1x16x128xf32>,
    %cst_7 = arith.constant 0.000000e+00 : f32
    %4 = vector.broadcast %cst_7 : f32 to vector<16x128xf32>
    %c0_8 = arith.constant 0 : index
    %c0_9 = arith.constant 0 : index
    %c0_10 = arith.constant 0 : index
    %5 = vector.load %arg9[%c0_8, %c0_9, %c0_10] : memref<1x18x128xf32, #tpu.memory_space<vmem>>, vector<1x16x128xf32>
    %6 = vector.shape_cast %5 : vector<1x16x128xf32> to vector<16x128xf32>
    %c0_11 = arith.constant 0 : index
    %c0_12 = arith.constant 0 : index
    %c0_13 = arith.constant 0 : index
    %7 = vector.load %arg2[%c0_11, %c0_12, %c0_13] : memref<3x128x128xf32, #tpu.memory_space<vmem>>, vector<1x128x128xf32>
    %8 = vector.shape_cast %7 : vector<1x128x128xf32> to vector<128x128xf32>
    %cst_14 = arith.constant dense<0.000000e+00> : vector<16x128xf32>
    %9 = tpu.matmul %6, %8, %cst_14 {dimension_numbers = #tpu.dot_dimension_numbers<[1], [0], [0], [1], [0, 0, 1, 1], [], []>} : vector<16x128xf32>, vector<128x128xf32>, vector<16x128xf32> -> vector<16x128xf32>
    %10 = arith.addf %4, %9 : vector<16x128xf32>
    %c0_15 = arith.constant 0 : index
    %c1_16 = arith.constant 1 : index
    %c0_17 = arith.constant 0 : index
    %11 = vector.load %arg9[%c0_15, %c1_16, %c0_17] : memref<1x18x128xf32, #tpu.memory_space<vmem>>, vector<1x16x128xf32>
    %12 = vector.shape_cast %11 : vector<1x16x128xf32> to vector<16x128xf32>
    %c1_18 = arith.constant 1 : index
    %c0_19 = arith.constant 0 : index
    %c0_20 = arith.constant 0 : index
    %13 = vector.load %arg2[%c1_18, %c0_19, %c0_20] : memref<3x128x128xf32, #tpu.memory_space<vmem>>, vector<1x128x128xf32>
    %14 = vector.shape_cast %13 : vector<1x128x128xf32> to vector<128x128xf32>
    %cst_21 = arith.constant dense<0.000000e+00> : vector<16x128xf32>
    %15 = tpu.matmul %12, %14, %cst_21 {dimension_numbers = #tpu.dot_dimension_numbers<[1], [0], [0], [1], [0, 0, 1, 1], [], []>} : vector<16x128xf32>, vector<128x128xf32>, vector<16x128xf32> -> vector<16x128xf32>
    %16 = arith.addf %10, %15 : vector<16x128xf32>
    %c0_22 = arith.constant 0 : index
    %c2 = arith.constant 2 : index
    %c0_23 = arith.constant 0 : index
    %17 = vector.load %arg9[%c0_22, %c2, %c0_23] : memref<1x18x128xf32, #tpu.memory_space<vmem>>, vector<1x16x128xf32>
    %18 = vector.shape_cast %17 : vector<1x16x128xf32> to vector<16x128xf32>
    %c2_24 = arith.constant 2 : index
    %c0_25 = arith.constant 0 : index
    %c0_26 = arith.constant 0 : index
    %19 = vector.load %arg2[%c2_24, %c0_25, %c0_26] : memref<3x128x128xf32, #tpu.memory_space<vmem>>, vector<1x128x128xf32>
    %20 = vector.shape_cast %19 : vector<1x128x128xf32> to vector<128x128xf32>
    %cst_27 = arith.constant dense<0.000000e+00> : vector<16x128xf32>
    %21 = tpu.matmul %18, %20, %cst_27 {dimension_numbers = #tpu.dot_dimension_numbers<[1], [0], [0], [1], [0, 0, 1, 1], [], []>} : vector<16x128xf32>, vector<128x128xf32>, vector<16x128xf32> -> vector<16x128xf32>
    %22 = arith.addf %16, %21 : vector<16x128xf32>
    %c0_28 = arith.constant 0 : index
    %c0_29 = arith.constant 0 : index
    %23 = vector.load %arg3[%c0_28, %c0_29] : memref<1x128xf32, #tpu.memory_space<vmem>>, vector<1x128xf32>
    %24 = vector.broadcast %23 : vector<1x128xf32> to vector<16x128xf32>
    %25 = arith.addf %22, %24 : vector<16x128xf32>
    %26 = vector.shape_cast %25 : vector<16x128xf32> to vector<1x16x128xf32>
    %cst_30 = arith.constant dense<0.000000e+00> : vector<1x128xf32>
    %27 = vector.multi_reduction <add>, %26, %cst_30 [1] : vector<1x16x128xf32> to vector<1x128xf32>
    %28 = arith.mulf %26, %26 : vector<1x16x128xf32>
    %cst_31 = arith.constant dense<0.000000e+00> : vector<1x128xf32>
    %29 = vector.multi_reduction <add>, %28, %cst_31 [1] : vector<1x16x128xf32> to vector<1x128xf32>
    %c0_32 = arith.constant 0 : index
    %c0_33 = arith.constant 0 : index
    %30 = vector.load %arg6[%c0_32, %c0_33] : memref<128x8xf32, #tpu.memory_space<vmem>>, vector<128x8xf32>
    %cst_34 = arith.constant dense<0.000000e+00> : vector<1x8xf32>
    %31 = tpu.matmul %27, %30, %cst_34 {dimension_numbers = #tpu.dot_dimension_numbers<[1], [0], [0], [1], [0, 0, 1, 1], [], []>} : vector<1x128xf32>, vector<128x8xf32>, vector<1x8xf32> -> vector<1x8xf32>
    %cst_35 = arith.constant 3.906250e-03 : f32
    %32 = vector.broadcast %cst_35 : f32 to vector<1x8xf32>
    %33 = arith.mulf %31, %32 : vector<1x8xf32>
    %c0_36 = arith.constant 0 : index
    %c0_37 = arith.constant 0 : index
    %34 = vector.load %arg6[%c0_36, %c0_37] : memref<128x8xf32, #tpu.memory_space<vmem>>, vector<128x8xf32>
    %cst_38 = arith.constant dense<0.000000e+00> : vector<1x8xf32>
    %35 = tpu.matmul %29, %34, %cst_38 {dimension_numbers = #tpu.dot_dimension_numbers<[1], [0], [0], [1], [0, 0, 1, 1], [], []>} : vector<1x128xf32>, vector<128x8xf32>, vector<1x8xf32> -> vector<1x8xf32>
    %cst_39 = arith.constant 3.906250e-03 : f32
    %36 = vector.broadcast %cst_39 : f32 to vector<1x8xf32>
    %37 = arith.mulf %35, %36 : vector<1x8xf32>
    %38 = arith.mulf %33, %33 : vector<1x8xf32>
    %39 = arith.subf %37, %38 : vector<1x8xf32>
    %cst_40 = arith.constant 0.000000e+00 : f32
    %40 = vector.broadcast %cst_40 : f32 to vector<1x8xf32>
    %41 = arith.maximumf %39, %40 : vector<1x8xf32>
    %cst_41 = arith.constant 9.99999974E-6 : f32
    %42 = vector.broadcast %cst_41 : f32 to vector<1x8xf32>
    %43 = arith.addf %41, %42 : vector<1x8xf32>
    %44 = math.rsqrt %43 : vector<1x8xf32>
    %c0_42 = arith.constant 0 : index
    %c0_43 = arith.constant 0 : index
    %45 = vector.load %arg7[%c0_42, %c0_43] : memref<8x128xf32, #tpu.memory_space<vmem>>, vector<8x128xf32>
    %cst_44 = arith.constant dense<0.000000e+00> : vector<1x128xf32>
    %46 = tpu.matmul %33, %45, %cst_44 {dimension_numbers = #tpu.dot_dimension_numbers<[1], [0], [0], [1], [0, 0, 1, 1], [], []>} : vector<1x8xf32>, vector<8x128xf32>, vector<1x128xf32> -> vector<1x128xf32>
    %c0_45 = arith.constant 0 : index
    %c0_46 = arith.constant 0 : index
    %47 = vector.load %arg7[%c0_45, %c0_46] : memref<8x128xf32, #tpu.memory_space<vmem>>, vector<8x128xf32>
    %cst_47 = arith.constant dense<0.000000e+00> : vector<1x128xf32>
    %48 = tpu.matmul %44, %47, %cst_47 {dimension_numbers = #tpu.dot_dimension_numbers<[1], [0], [0], [1], [0, 0, 1, 1], [], []>} : vector<1x8xf32>, vector<8x128xf32>, vector<1x128xf32> -> vector<1x128xf32>
    %49 = vector.shape_cast %46 : vector<1x128xf32> to vector<1x1x128xf32>
    %50 = vector.broadcast %49 : vector<1x1x128xf32> to vector<1x16x128xf32>
    %51 = arith.subf %26, %50 : vector<1x16x128xf32>
    %52 = vector.shape_cast %48 : vector<1x128xf32> to vector<1x1x128xf32>
    %53 = vector.broadcast %52 : vector<1x1x128xf32> to vector<1x16x128xf32>
    %54 = arith.mulf %51, %53 : vector<1x16x128xf32>
    %cst_48 = arith.constant 0.000000e+00 : f32
    %55 = vector.broadcast %cst_48 : f32 to vector<1x16x128xf32>
    %56 = arith.maximumf %54, %55 : vector<1x16x128xf32>
    %c0_49 = arith.constant 0 : index
    %c1_50 = arith.constant 1 : index
    %c0_51 = arith.constant 0 : index
    %57 = vector.load %arg9[%c0_49, %c1_50, %c0_51] : memref<1x18x128xf32, #tpu.memory_space<vmem>>, vector<1x16x128xf32>
    tpu.vector_store %arg9[%c0_49, %c1_50, %c0_51], %56 {strides = array<i32>} : memref<1x18x128xf32, #tpu.memory_space<vmem>>, vector<1x16x128xf32>,
    %cst_52 = arith.constant 0.000000e+00 : f32
    %58 = vector.broadcast %cst_52 : f32 to vector<16x128xf32>
    %c0_53 = arith.constant 0 : index
    %c0_54 = arith.constant 0 : index
    %c0_55 = arith.constant 0 : index
    %59 = vector.load %arg9[%c0_53, %c0_54, %c0_55] : memref<1x18x128xf32, #tpu.memory_space<vmem>>, vector<1x16x128xf32>
    %60 = vector.shape_cast %59 : vector<1x16x128xf32> to vector<16x128xf32>
    %c0_56 = arith.constant 0 : index
    %c0_57 = arith.constant 0 : index
    %c0_58 = arith.constant 0 : index
    %61 = vector.load %arg4[%c0_56, %c0_57, %c0_58] : memref<3x128x128xf32, #tpu.memory_space<vmem>>, vector<1x128x128xf32>
    %62 = vector.shape_cast %61 : vector<1x128x128xf32> to vector<128x128xf32>
    %cst_59 = arith.constant dense<0.000000e+00> : vector<16x128xf32>
    %63 = tpu.matmul %60, %62, %cst_59 {dimension_numbers = #tpu.dot_dimension_numbers<[1], [0], [0], [1], [0, 0, 1, 1], [], []>} : vector<16x128xf32>, vector<128x128xf32>, vector<16x128xf32> -> vector<16x128xf32>
    %64 = arith.addf %58, %63 : vector<16x128xf32>
    %c0_60 = arith.constant 0 : index
    %c1_61 = arith.constant 1 : index
    %c0_62 = arith.constant 0 : index
    %65 = vector.load %arg9[%c0_60, %c1_61, %c0_62] : memref<1x18x128xf32, #tpu.memory_space<vmem>>, vector<1x16x128xf32>
    %66 = vector.shape_cast %65 : vector<1x16x128xf32> to vector<16x128xf32>
    %c1_63 = arith.constant 1 : index
    %c0_64 = arith.constant 0 : index
    %c0_65 = arith.constant 0 : index
    %67 = vector.load %arg4[%c1_63, %c0_64, %c0_65] : memref<3x128x128xf32, #tpu.memory_space<vmem>>, vector<1x128x128xf32>
    %68 = vector.shape_cast %67 : vector<1x128x128xf32> to vector<128x128xf32>
    %cst_66 = arith.constant dense<0.000000e+00> : vector<16x128xf32>
    %69 = tpu.matmul %66, %68, %cst_66 {dimension_numbers = #tpu.dot_dimension_numbers<[1], [0], [0], [1], [0, 0, 1, 1], [], []>} : vector<16x128xf32>, vector<128x128xf32>, vector<16x128xf32> -> vector<16x128xf32>
    %70 = arith.addf %64, %69 : vector<16x128xf32>
    %c0_67 = arith.constant 0 : index
    %c2_68 = arith.constant 2 : index
    %c0_69 = arith.constant 0 : index
    %71 = vector.load %arg9[%c0_67, %c2_68, %c0_69] : memref<1x18x128xf32, #tpu.memory_space<vmem>>, vector<1x16x128xf32>
    %72 = vector.shape_cast %71 : vector<1x16x128xf32> to vector<16x128xf32>
    %c2_70 = arith.constant 2 : index
    %c0_71 = arith.constant 0 : index
    %c0_72 = arith.constant 0 : index
    %73 = vector.load %arg4[%c2_70, %c0_71, %c0_72] : memref<3x128x128xf32, #tpu.memory_space<vmem>>, vector<1x128x128xf32>
    %74 = vector.shape_cast %73 : vector<1x128x128xf32> to vector<128x128xf32>
    %cst_73 = arith.constant dense<0.000000e+00> : vector<16x128xf32>
    %75 = tpu.matmul %72, %74, %cst_73 {dimension_numbers = #tpu.dot_dimension_numbers<[1], [0], [0], [1], [0, 0, 1, 1], [], []>} : vector<16x128xf32>, vector<128x128xf32>, vector<16x128xf32> -> vector<16x128xf32>
    %76 = arith.addf %70, %75 : vector<16x128xf32>
    %c0_74 = arith.constant 0 : index
    %c0_75 = arith.constant 0 : index
    %77 = vector.load %arg5[%c0_74, %c0_75] : memref<1x128xf32, #tpu.memory_space<vmem>>, vector<1x128xf32>
    %78 = vector.broadcast %77 : vector<1x128xf32> to vector<16x128xf32>
    %79 = arith.addf %76, %78 : vector<16x128xf32>
    %80 = vector.shape_cast %79 : vector<16x128xf32> to vector<1x16x128xf32>
    %cst_76 = arith.constant dense<0.000000e+00> : vector<1x128xf32>
    %81 = vector.multi_reduction <add>, %80, %cst_76 [1] : vector<1x16x128xf32> to vector<1x128xf32>
    %82 = arith.mulf %80, %80 : vector<1x16x128xf32>
    %cst_77 = arith.constant dense<0.000000e+00> : vector<1x128xf32>
    %83 = vector.multi_reduction <add>, %82, %cst_77 [1] : vector<1x16x128xf32> to vector<1x128xf32>
    %c0_78 = arith.constant 0 : index
    %c0_79 = arith.constant 0 : index
    %84 = vector.load %arg6[%c0_78, %c0_79] : memref<128x8xf32, #tpu.memory_space<vmem>>, vector<128x8xf32>
    %cst_80 = arith.constant dense<0.000000e+00> : vector<1x8xf32>
    %85 = tpu.matmul %81, %84, %cst_80 {dimension_numbers = #tpu.dot_dimension_numbers<[1], [0], [0], [1], [0, 0, 1, 1], [], []>} : vector<1x128xf32>, vector<128x8xf32>, vector<1x8xf32> -> vector<1x8xf32>
    %cst_81 = arith.constant 3.906250e-03 : f32
    %86 = vector.broadcast %cst_81 : f32 to vector<1x8xf32>
    %87 = arith.mulf %85, %86 : vector<1x8xf32>
    %c0_82 = arith.constant 0 : index
    %c0_83 = arith.constant 0 : index
    %88 = vector.load %arg6[%c0_82, %c0_83] : memref<128x8xf32, #tpu.memory_space<vmem>>, vector<128x8xf32>
    %cst_84 = arith.constant dense<0.000000e+00> : vector<1x8xf32>
    %89 = tpu.matmul %83, %88, %cst_84 {dimension_numbers = #tpu.dot_dimension_numbers<[1], [0], [0], [1], [0, 0, 1, 1], [], []>} : vector<1x128xf32>, vector<128x8xf32>, vector<1x8xf32> -> vector<1x8xf32>
    %cst_85 = arith.constant 3.906250e-03 : f32
    %90 = vector.broadcast %cst_85 : f32 to vector<1x8xf32>
    %91 = arith.mulf %89, %90 : vector<1x8xf32>
    %92 = arith.mulf %87, %87 : vector<1x8xf32>
    %93 = arith.subf %91, %92 : vector<1x8xf32>
    %cst_86 = arith.constant 0.000000e+00 : f32
    %94 = vector.broadcast %cst_86 : f32 to vector<1x8xf32>
    %95 = arith.maximumf %93, %94 : vector<1x8xf32>
    %cst_87 = arith.constant 9.99999974E-6 : f32
    %96 = vector.broadcast %cst_87 : f32 to vector<1x8xf32>
    %97 = arith.addf %95, %96 : vector<1x8xf32>
    %98 = math.rsqrt %97 : vector<1x8xf32>
    %c0_88 = arith.constant 0 : index
    %c0_89 = arith.constant 0 : index
    %99 = vector.load %arg7[%c0_88, %c0_89] : memref<8x128xf32, #tpu.memory_space<vmem>>, vector<8x128xf32>
    %cst_90 = arith.constant dense<0.000000e+00> : vector<1x128xf32>
    %100 = tpu.matmul %87, %99, %cst_90 {dimension_numbers = #tpu.dot_dimension_numbers<[1], [0], [0], [1], [0, 0, 1, 1], [], []>} : vector<1x8xf32>, vector<8x128xf32>, vector<1x128xf32> -> vector<1x128xf32>
    %c0_91 = arith.constant 0 : index
    %c0_92 = arith.constant 0 : index
    %101 = vector.load %arg7[%c0_91, %c0_92] : memref<8x128xf32, #tpu.memory_space<vmem>>, vector<8x128xf32>
    %cst_93 = arith.constant dense<0.000000e+00> : vector<1x128xf32>
    %102 = tpu.matmul %98, %101, %cst_93 {dimension_numbers = #tpu.dot_dimension_numbers<[1], [0], [0], [1], [0, 0, 1, 1], [], []>} : vector<1x8xf32>, vector<8x128xf32>, vector<1x128xf32> -> vector<1x128xf32>
    %103 = vector.shape_cast %100 : vector<1x128xf32> to vector<1x1x128xf32>
    %104 = vector.broadcast %103 : vector<1x1x128xf32> to vector<1x16x128xf32>
    %105 = arith.subf %80, %104 : vector<1x16x128xf32>
    %106 = vector.shape_cast %102 : vector<1x128xf32> to vector<1x1x128xf32>
    %107 = vector.broadcast %106 : vector<1x1x128xf32> to vector<1x16x128xf32>
    %108 = arith.mulf %105, %107 : vector<1x16x128xf32>
    %cst_94 = arith.constant 0.000000e+00 : f32
    %109 = vector.broadcast %cst_94 : f32 to vector<1x16x128xf32>
    %110 = arith.maximumf %108, %109 : vector<1x16x128xf32>
    %111 = arith.addf %110, %2 : vector<1x16x128xf32>
    %c0_95 = arith.constant 0 : index
    %c0_96 = arith.constant 0 : index
    %c0_97 = arith.constant 0 : index
    %112 = vector.load %arg8[%c0_95, %c0_96, %c0_97] : memref<1x16x128xf32, #tpu.memory_space<vmem>>, vector<1x16x128xf32>
    tpu.vector_store %arg8[%c0_95, %c0_96, %c0_97], %111 {strides = array<i32>} : memref<1x16x128xf32, #tpu.memory_space<vmem>>, vector<1x16x128xf32>,
    return
  }
  func.func @transform_0(%arg0: i32) -> (i32, i32, i32) {
    %c0_i32 = arith.constant 0 : i32
    %c0_i32_0 = arith.constant 0 : i32
    %c0_i32_1 = arith.constant 0 : i32
    return %arg0, %c0_i32, %c0_i32_0 : i32, i32, i32
  }
  func.func @transform_1(%arg0: i32) -> (i32, i32, i32) {
    %c0_i32 = arith.constant 0 : i32
    %c0_i32_0 = arith.constant 0 : i32
    %c0_i32_1 = arith.constant 0 : i32
    %c0_i32_2 = arith.constant 0 : i32
    return %c0_i32, %c0_i32_0, %c0_i32_1 : i32, i32, i32
  }
  func.func @transform_2(%arg0: i32) -> (i32, i32) {
    %c0_i32 = arith.constant 0 : i32
    %c0_i32_0 = arith.constant 0 : i32
    %c0_i32_1 = arith.constant 0 : i32
    return %c0_i32, %c0_i32_0 : i32, i32
  }
  func.func @transform_3(%arg0: i32) -> (i32, i32, i32) {
    %c0_i32 = arith.constant 0 : i32
    %c0_i32_0 = arith.constant 0 : i32
    %c0_i32_1 = arith.constant 0 : i32
    %c0_i32_2 = arith.constant 0 : i32
    return %c0_i32, %c0_i32_0, %c0_i32_1 : i32, i32, i32
  }
  func.func @transform_4(%arg0: i32) -> (i32, i32) {
    %c0_i32 = arith.constant 0 : i32
    %c0_i32_0 = arith.constant 0 : i32
    %c0_i32_1 = arith.constant 0 : i32
    return %c0_i32, %c0_i32_0 : i32, i32
  }
  func.func @transform_5(%arg0: i32) -> (i32, i32) {
    %c0_i32 = arith.constant 0 : i32
    %c0_i32_0 = arith.constant 0 : i32
    %c0_i32_1 = arith.constant 0 : i32
    return %c0_i32, %c0_i32_0 : i32, i32
  }
  func.func @transform_6(%arg0: i32) -> (i32, i32) {
    %c0_i32 = arith.constant 0 : i32
    %c0_i32_0 = arith.constant 0 : i32
    %c0_i32_1 = arith.constant 0 : i32
    return %c0_i32, %c0_i32_0 : i32, i32
  }
  func.func @transform_7(%arg0: i32) -> (i32, i32, i32) {
    %c0_i32 = arith.constant 0 : i32
    %c0_i32_0 = arith.constant 0 : i32
    %c0_i32_1 = arith.constant 0 : i32
    return %arg0, %c0_i32, %c0_i32_0 : i32, i32, i32
  }
}

</mosaic_0001>

<bundles_post_ra>
// kernel: tpu_custom_call.1
= control target key start
LH: loop header
LB: loop body
LE: loop exit
PB: predicated region body
PF: predicated region fallthrough
CT: control target
= control target key end

     0   :  { %12 = vsyncpa [#allocation4], 0  ;;  %s994_s0 = inlined_call_operand.vmem [shape: f32[1,16,128], index: 0, kind: input, shape index: {}]   ;;  %s995_s1 = inlined_call_operand.hbm [shape: f32[3,128,128], index: 1, kind: input, shape index: {}]   ;;  %s996_s2 = inlined_call_operand.vmem [shape: f32[1,128], index: 2, kind: input, shape index: {}]   ;;  %s997_s3 = inlined_call_operand.hbm [shape: f32[3,128,128], index: 3, kind: input, shape index: {}]   ;;  %s998_s4 = inlined_call_operand.vmem [shape: f32[1,128], index: 4, kind: input, shape index: {}]   ;;  %s999_s5 = inlined_call_operand.vmem [shape: f32[128,8], index: 5, kind: input, shape index: {}]   ;;  %s1000_s6 = inlined_call_operand.vmem [shape: f32[8,128], index: 6, kind: input, shape index: {}]   ;;  %s1001_s7 = inlined_call_operand.hbm [shape: f32[1,16,128], index: 7, kind: output, shape index: {}]  }
   0x1   :  { %13 = vsyncpa [#allocation7], 0 }
   0x2   :  { %14 = vsyncpa [#allocation5], 0  ;;  %s21_s26 = sshll.u32 %s995_s1, 4  ;;  %s739_s27 = smov [#allocation3]   ;;  %s22_s26 = int_to_ptr.hbm [resolvable:$true] %s21_s26 }
   0x3   :  { %s23_s28 = sshll.u32 %s739_s27, 4  ;;  %s36_s8 = sshll.u32 %s997_s3, 4  ;;  %s24_s28 = int_to_ptr.vmem [resolvable:$true] %s23_s28  ;;  %s37_s8 = int_to_ptr.hbm [resolvable:$true] %s36_s8 }
   0x4   :  { %s740_s9 = smov 128   ;;  %s741_s10 = smov 8  }
   0x5   :  { %29 = dma.hbm_to_vmem [thread:$0]  %s22_s26, 6144, %s24_s28, [#allocation4], %s740_s9, %s740_s9, %s741_s10  }
   0x6   :  { %s742_s11 = smov [#allocation6]  }
   0x7   :  { %s38_s12 = sshll.u32 %s742_s11, 4  ;;  %s39_s12 = int_to_ptr.vmem [resolvable:$true] %s38_s12 }
   0x8   :  { %44 = dma.hbm_to_vmem [thread:$0]  %s37_s8, 6144, %s39_s12, [#allocation7], %s740_s9, %s740_s9, %s741_s10  }
   0x9   :  { %733 = dma.done.wait [#allocation4], 6144  }
   0xa   :  { %734 = vsyncadd [#allocation4], 4294961152 }
   0xb   :  { %735 = dma.done.wait [#allocation7], 6144  }
   0xc   :  { %736 = vsyncadd [#allocation7], 4294961152  ;;  %v743_v0 = vmov 0.0   ;;  %v167_v1 = vld [vmem:[#allocation3 + $0x178] sm:$0xff]  ;;  %v166_v2 = vld [vmem:[#allocation3 + $0x170] sm:$0xff]  ;;  %vm288_vm0 = vcmask 64512  }
   0xd   :  { %59 = vst [vmem:[#allocation2] sm:$0xff] %v743_v0  ;;  %v102_v3 = vld [vmem:[#allocation3 + $0xf8] sm:$0xff]  ;;  %168 = vmatpush.msra.mxu2 %v167_v1  ;;  %v101_v5 = vld [vmem:[#allocation3 + $0xf0] sm:$0xff]  ;;  %v165_v6 = vld [vmem:[#allocation3 + $0x168] sm:$0xff]  ;;  %s631_s28 = sshll.u32 %s1001_s7, 4  ;;  %s632_s28 = int_to_ptr.hbm [resolvable:$true] %s631_s28 }
   0xe   :  { %60 = vst [vmem:[#allocation2 + $0x8] sm:$0xff] %v743_v0  ;;  %103 = vmatpush.msra.mxu0 %v102_v3  ;;  %v83_v4 = vld [vmem:[#allocation3 + $0x78] sm:$0xff]  ;;  %v82_v7 = vld [vmem:[#allocation3 + $0x70] sm:$0xff]  ;;  %v100_v8 = vld [vmem:[#allocation3 + $0xe8] sm:$0xff] }
   0xf   :  { %61 = vst [vmem:[#allocation2 + $0x10] sm:$0x3] %v743_v0  ;;  %126 = vmatpush.msra.mxu1 %v83_v4  ;;  %169 = vmatpush.msra.mxu2 %v166_v2  ;;  %v81_v9 = vld [vmem:[#allocation3 + $0x68] sm:$0xff]  ;;  %v164_v10 = vld [vmem:[#allocation3 + $0x160] sm:$0xff]  ;;  %v163_v13 = vld [vmem:[#allocation3 + $0x158] sm:$0xff] }
  0x10   :  { %104 = vmatpush.msra.mxu0 %v101_v5  ;;  %v99_v11 = vld [vmem:[#allocation3 + $0xe0] sm:$0xff]  ;;  %v98_v14 = vld [vmem:[#allocation3 + $0xd8] sm:$0xff]  ;;  %v162_v16 = vld [vmem:[#allocation3 + $0x150] sm:$0xff] }
  0x11   :  { %127 = vmatpush.msra.mxu1 %v82_v7  ;;  %170 = vmatpush.msra.mxu2 %v165_v6  ;;  %v80_v12 = vld [vmem:[#allocation3 + $0x60] sm:$0xff]  ;;  %v79_v15 = vld [vmem:[#allocation3 + $0x58] sm:$0xff]  ;;  %v97_v17 = vld [vmem:[#allocation3 + $0xd0] sm:$0xff] }
  0x12   :  { %105 = vmatpush.msra.mxu0 %v100_v8  ;;  %v78_v18 = vld [vmem:[#allocation3 + $0x50] sm:$0xff]  ;;  %v161_v19 = vld [vmem:[#allocation3 + $0x148] sm:$0xff]  ;;  %v160_v22 = vld [vmem:[#allocation3 + $0x140] sm:$0xff] }
  0x13   :  { %128 = vmatpush.msra.mxu1 %v81_v9  ;;  %171 = vmatpush.msra.mxu2 %v164_v10  ;;  %v96_v20 = vld [vmem:[#allocation3 + $0xc8] sm:$0xff]  ;;  %v95_v23 = vld [vmem:[#allocation3 + $0xc0] sm:$0xff]  ;;  %v159_v25 = vld [vmem:[#allocation3 + $0x138] sm:$0xff] }
  0x14   :  { %106 = vmatpush.msra.mxu0 %v99_v11  ;;  %v77_v21 = vld [vmem:[#allocation3 + $0x48] sm:$0xff]  ;;  %v76_v24 = vld [vmem:[#allocation3 + $0x40] sm:$0xff]  ;;  %v94_v26 = vld [vmem:[#allocation3 + $0xb8] sm:$0xff] }
  0x15   :  { %129 = vmatpush.msra.mxu1 %v80_v12  ;;  %172 = vmatpush.msra.mxu2 %v163_v13  ;;  %v800_v27 = vld [vmem:[%s994_s0] sm:$0xff]  ;;  %v75_v28 = vld [vmem:[#allocation3 + $0x38] sm:$0xff]  ;;  %v805_v29 = vld [vmem:[%s994_s0 + $0x8] sm:$0xff] }
  0x16   :  { %107 = vmatpush.msra.mxu0 %v98_v14  ;;  %64 = vst [vmem:[#allocation2 + $0x1] sm:$0xff] %v800_v27  ;;  %v158_v30 = vld [vmem:[#allocation3 + $0x130] sm:$0xff]  ;;  %v812_v32 = vld [vmem:[%s999_s5 + $0x78] sm:$0xff]  ;;  %v157_v34 = vld [vmem:[#allocation3 + $0x128] sm:$0xff] }
  0x17   :  { %130 = vmatpush.msra.mxu1 %v79_v15  ;;  %173 = vmatpush.msra.mxu2 %v162_v16  ;;  %v93_v31 = vld [vmem:[#allocation3 + $0xb0] sm:$0xff]  ;;  %65 = vst [vmem:[#allocation2 + $0x9] sm:$0xff] %v805_v29  ;;  %v92_v35 = vld [vmem:[#allocation3 + $0xa8] sm:$0xff]  ;;  %v156_v37 = vld [vmem:[#allocation3 + $0x120] sm:$0xff] }
  0x18   :  { %108 = vmatpush.msra.mxu0 %v97_v17  ;;  %v74_v33 = vld [vmem:[#allocation3 + $0x30] sm:$0xff]  ;;  %231 = vmatpush.msra.mxu3 %v812_v32  ;;  %v73_v36 = vld [vmem:[#allocation3 + $0x28] sm:$0xff]  ;;  %v91_v38 = vld [vmem:[#allocation3 + $0xa0] sm:$0xff] }
  0x19   :  { %131 = vmatpush.msra.mxu1 %v78_v18  ;;  %174 = vmatpush.msra.mxu2 %v161_v19  ;;  %v72_v39 = vld [vmem:[#allocation3 + $0x20] sm:$0xff]  ;;  %v155_v40 = vld [vmem:[#allocation3 + $0x118] sm:$0xff]  ;;  %v154_v43 = vld [vmem:[#allocation3 + $0x110] sm:$0xff] }
  0x1a   :  { %109 = vmatpush.msra.mxu0 %v96_v20  ;;  %v90_v41 = vld [vmem:[#allocation3 + $0x98] sm:$0xff]  ;;  %v89_v44 = vld [vmem:[#allocation3 + $0x90] sm:$0xff]  ;;  %v153_v46 = vld [vmem:[#allocation3 + $0x108] sm:$0xff] }
  0x1b   :  { %132 = vmatpush.msra.mxu1 %v77_v21  ;;  %175 = vmatpush.msra.mxu2 %v160_v22  ;;  %v71_v42 = vld [vmem:[#allocation3 + $0x18] sm:$0xff]  ;;  %v70_v45 = vld [vmem:[#allocation3 + $0x10] sm:$0xff]  ;;  %v88_v47 = vld [vmem:[#allocation3 + $0x88] sm:$0xff] }
  0x1c   :  { %110 = vmatpush.msra.mxu0 %v95_v23  ;;  %v69_v48 = vld [vmem:[#allocation3 + $0x8] sm:$0xff]  ;;  %v152_v49 = vld [vmem:[#allocation3 + $0x100] sm:$0xff]  ;;  %v821_v56 = vld [vmem:[%s999_s5 + $0x70] sm:$0xff] }
  0x1d   :  { %133 = vmatpush.msra.mxu1 %v76_v24  ;;  %176 = vmatpush.msra.mxu2 %v159_v25  ;;  %v87_v50 = vld [vmem:[#allocation3 + $0x80] sm:$0xff]  ;;  %v66_v53 = vld [vmem:[#allocation2] sm:$0xff]  ;;  %v828_v57 = vld [vmem:[%s999_s5 + $0x68] sm:$0xff] }
  0x1e   :  { %111 = vmatpush.msra.mxu0 %v94_v26  ;;  %v149_v51 = vld [vmem:[#allocation2 + $0x2] sm:$0xff]  ;;  %v68_v52 = vld [vmem:[#allocation3] sm:$0xff]  ;;  %v150_v54 = vld [vmem:[#allocation2 + $0xa] sm:$0xff]  ;;  %232 = vmatpush.msra.mxu3 %v821_v56 }
  0x1f   :  { %134 = vmatpush.msra.mxu1 %v75_v28  ;;  %177 = vmatpush.msra.mxu2 %v158_v30  ;;  %v67_v55 = vld [vmem:[#allocation2 + $0x8] sm:$0xff]  ;;  %v835_v58 = vld [vmem:[%s999_s5 + $0x60] sm:$0xff]  ;;  %v842_v59 = vld [vmem:[%s999_s5 + $0x58] sm:$0xff] }
  0x20   :  { %112 = vmatpush.msra.mxu0 %v93_v31  ;;  %233 = vmatpush.msra.mxu3 %v828_v57  ;;  %v849_v60 = vld [vmem:[%s999_s5 + $0x50] sm:$0xff]  ;;  %v856_v61 = vld [vmem:[%s999_s5 + $0x48] sm:$0xff]  ;;  %v863_v62 = vld [vmem:[%s999_s5 + $0x40] sm:$0xff] }
  0x21   :  { %135 = vmatpush.msra.mxu1 %v74_v33  ;;  %178 = vmatpush.msra.mxu2 %v157_v34  ;;  %v870_v63 = vld [vmem:[%s999_s5 + $0x38] sm:$0xff]  ;;  %v877_v0 = vld [vmem:[%s999_s5 + $0x30] sm:$0xff]  ;;  %v884_v1 = vld [vmem:[%s999_s5 + $0x28] sm:$0xff] }
  0x22   :  { %113 = vmatpush.msra.mxu0 %v92_v35  ;;  %234 = vmatpush.msra.mxu3 %v835_v58  ;;  %v889_v2 = vld [vmem:[%s999_s5 + $0x20] sm:$0xff]  ;;  %v896_v3 = vld [vmem:[%s999_s5 + $0x18] sm:$0xff]  ;;  %v903_v4 = vld [vmem:[%s999_s5 + $0x10] sm:$0xff] }
  0x23   :  { %136 = vmatpush.msra.mxu1 %v73_v36  ;;  %179 = vmatpush.msra.mxu2 %v156_v37  ;;  %v910_v5 = vld [vmem:[%s999_s5 + $0x8] sm:$0xff]  ;;  %v917_v6 = vld [vmem:[%s999_s5] sm:$0xff] }
  0x24   :  { %114 = vmatpush.msra.mxu0 %v91_v38  ;;  %235 = vmatpush.msra.mxu3 %v842_v59  ;;  %v655_v14 = vld [vmem:[%s996_s2] ss:$0 sm:$0xff] }
  0x25   :  { %137 = vmatpush.msra.mxu1 %v72_v39  ;;  %180 = vmatpush.msra.mxu2 %v155_v40  ;;  %v955_v39 = vld [vmem:[%s1000_s6] sm:$0xff] }
  0x26   :  { %115 = vmatpush.msra.mxu0 %v90_v41  ;;  %236 = vmatpush.msra.mxu3 %v849_v60 }
  0x27   :  { %138 = vmatpush.msra.mxu1 %v71_v42  ;;  %181 = vmatpush.msra.mxu2 %v154_v43 }
  0x28   :  { %116 = vmatpush.msra.mxu0 %v89_v44  ;;  %237 = vmatpush.msra.mxu3 %v856_v61 }
  0x29   :  { %139 = vmatpush.msra.mxu1 %v70_v45  ;;  %182 = vmatpush.msra.mxu2 %v153_v46 }
  0x2a   :  { %117 = vmatpush.msra.mxu0 %v88_v47  ;;  %238 = vmatpush.msra.mxu3 %v863_v62 }
  0x2b   :  { %140 = vmatpush.msra.mxu1 %v69_v48  ;;  %183 = vmatpush.msra.mxu2 %v152_v49 }
  0x2c   :  { %118 = vmatpush.msra.mxu0 %v87_v50  ;;  %184 = vmatmul.f32.vlgmr.msra.gmra.mxu2 %v149_v51 }
  0x2d   :  { %141 = vmatpush.msra.mxu1 %v68_v52  ;;  %119 = vmatmul.f32.vlgmr.msra.gmra.mxu0 %v800_v27 }
  0x2e   :  { %142 = vmatmul.f32.vlgmr.msra.gmra.mxu1 %v66_v53  ;;  %252 = vmatpush.msrb.mxu0 %v812_v32 }
  0x2f   :  { %239 = vmatpush.msra.mxu3 %v870_v63  ;;  %330 = vmatpush.msrb.mxu1 %v955_v39 }
  0x30   :  { %253 = vmatpush.msrb.mxu0 %v821_v56 }
  0x31   :  { %240 = vmatpush.msra.mxu3 %v877_v0 }
  0x32   :  { %254 = vmatpush.msrb.mxu0 %v828_v57 }
  0x33   :  { %241 = vmatpush.msra.mxu3 %v884_v1 }
  0x34   :  { %187 = vmatmul.f32.gmra.mxu2 %v150_v54  ;;  %255 = vmatpush.msrb.mxu0 %v835_v58 }
  0x35   :  { %122 = vmatmul.f32.gmra.mxu0 %v805_v29  ;;  %242 = vmatpush.msra.mxu3 %v889_v2 }
  0x36   :  { %145 = vmatmul.f32.gmra.mxu1 %v67_v55  ;;  %256 = vmatpush.msrb.mxu0 %v842_v59  ;;  %v381_v55 = vld [vmem:[#allocation6 + $0xf8] sm:$0xff] }
  0x37   :  { %243 = vmatpush.msra.mxu3 %v896_v3  ;;  %382 = vmatpush.msrb.mxu2 %v381_v55  ;;  %v433_v55 = vld [vmem:[#allocation6 + $0x110] sm:$0xff] }
  0x38   :  { %257 = vmatpush.msrb.mxu0 %v849_v60 }
  0x39   :  { %244 = vmatpush.msra.mxu3 %v903_v4 }
  0x3a   :  { %258 = vmatpush.msrb.mxu0 %v856_v61 }
  0x3b   :  { %245 = vmatpush.msra.mxu3 %v910_v5 }
  0x3c   :  { %259 = vmatpush.msrb.mxu0 %v863_v62 }
  0x3d   :  { %246 = vmatpush.msra.mxu3 %v917_v6 }
  0x3e   :  { %260 = vmatpush.msrb.mxu0 %v870_v63 }
  0x3f   :  { %307 = vmatpush.msrb.mxu3 %v955_v39 }
  0x40   :  { %261 = vmatpush.msrb.mxu0 %v877_v0 }
  0x42   :  { %262 = vmatpush.msrb.mxu0 %v884_v1 }
  0x44   :  { %263 = vmatpush.msrb.mxu0 %v889_v2 }
  0x46   :  { %264 = vmatpush.msrb.mxu0 %v896_v3 }
  0x48   :  { %265 = vmatpush.msrb.mxu0 %v903_v4 }
  0x4a   :  { %266 = vmatpush.msrb.mxu0 %v910_v5 }
  0x4c   :  { %267 = vmatpush.msrb.mxu0 %v917_v6 }
  0x4e   :  { %510 = vmatpush.msra.mxu0 %v812_v32 }
  0x50   :  { %511 = vmatpush.msra.mxu0 %v821_v56 }
  0x52   :  { %512 = vmatpush.msra.mxu0 %v828_v57 }
  0x54   :  { %513 = vmatpush.msra.mxu0 %v835_v58 }
  0x56   :  { %514 = vmatpush.msra.mxu0 %v842_v59 }
  0x58   :  { %515 = vmatpush.msra.mxu0 %v849_v60 }
  0x5a   :  { %516 = vmatpush.msra.mxu0 %v856_v61 }
  0x5c   :  { %517 = vmatpush.msra.mxu0 %v863_v62 }
  0x5e   :  { %518 = vmatpush.msra.mxu0 %v870_v63 }
  0x60   :  { %519 = vmatpush.msra.mxu0 %v877_v0 }
  0x62   :  { %520 = vmatpush.msra.mxu0 %v884_v1 }
  0x64   :  { %521 = vmatpush.msra.mxu0 %v889_v2 }
  0x66   :  { %522 = vmatpush.msra.mxu0 %v896_v3 }
  0x68   :  { %523 = vmatpush.msra.mxu0 %v903_v4 }
  0x6a   :  { %524 = vmatpush.msra.mxu0 %v910_v5 }
  0x6c   :  { %525 = vmatpush.msra.mxu0 %v917_v6 }
  0xaa   :  { %v120_v7 = vpop.f32.mrf.mxu0 }
  0xab   :  { %v143_v8 = vpop.f32.mrf.mxu1 }
  0xac   :  { %v144_v10 = vadd.f32 %v143_v8, %v120_v7  ;;  %v380_v7 = vld [vmem:[#allocation6 + $0xf0] sm:$0xff]  ;;  %v379_v8 = vld [vmem:[#allocation6 + $0xe8] sm:$0xff] }
  0xad   :  { %383 = vmatpush.msrb.mxu2 %v380_v7  ;;  %v348_v7 = vld [vmem:[#allocation6 + $0x8] sm:$0xff] }
  0xaf   :  { %v185_v9 = vpop.f32.mrf.mxu2  ;;  %384 = vmatpush.msrb.mxu2 %v379_v8  ;;  %v432_v8 = vld [vmem:[#allocation6 + $0x108] sm:$0xff] }
  0xb0   :  { %v191_v13 = vadd.f32 %v185_v9, %v144_v10  ;;  %v378_v9 = vld [vmem:[#allocation6 + $0xe0] sm:$0xff]  ;;  %v362_v10 = vld [vmem:[#allocation6 + $0x78] sm:$0xff] }
  0xb1   :  { %385 = vmatpush.msrb.mxu2 %v378_v9  ;;  %v347_v9 = vld [vmem:[#allocation6] sm:$0xff] }
  0xb2   :  { %v123_v11 = vpop.f32.mrf.mxu0  ;;  %v933_v17 = vadd.f32 %v655_v14, %v191_v13  ;;  %v445_v13 = vld [vmem:[#allocation6 + $0x170] sm:$0xff] }
  0xb3   :  { %v146_v12 = vpop.f32.mrf.mxu1 }
  0xb4   :  { %v147_v15 = vadd.f32 %v146_v12, %v123_v11  ;;  %v206_v20 = vmul.f32 %v933_v17, %v933_v17  ;;  %v446_v11 = vld [vmem:[#allocation6 + $0x178] sm:$0xff]  ;;  %v361_v12 = vld [vmem:[#allocation6 + $0x70] sm:$0xff] }
  0xb5   :  { %447 = vmatpush.msra.mxu1 %v446_v11 }
  0xb7   :  { %v188_v16 = vpop.f32.mrf.mxu2  ;;  %448 = vmatpush.msra.mxu1 %v445_v13 }
  0xb8   :  { %v192_v18 = vadd.f32 %v188_v16, %v147_v15  ;;  %v444_v15 = vld [vmem:[#allocation6 + $0x168] sm:$0xff]  ;;  %v377_v16 = vld [vmem:[#allocation6 + $0xd8] sm:$0xff] }
  0xb9   :  { %386 = vmatpush.msrb.mxu2 %v377_v16  ;;  %449 = vmatpush.msra.mxu1 %v444_v15 }
  0xba   :  { %v936_v19 = vadd.f32 %v655_v14, %v192_v18  ;;  %v360_v14 = vld [vmem:[#allocation6 + $0x68] sm:$0xff]  ;;  %v376_v18 = vld [vmem:[#allocation6 + $0xd0] sm:$0xff] }
  0xbb   :  { %387 = vmatpush.msrb.mxu2 %v376_v18 }
  0xbc   :  { %v199_v21 = vadd.f32 %v936_v19, %v933_v17  ;;  %v207_v22 = vmul.f32 %v936_v19, %v936_v19 }
  0xbe   :  { %v208_v23 = vadd.f32 %v207_v22, %v206_v20  ;;  %v200_v24 = vrot.slane %v199_v21, 4  ;;  %v359_v20 = vld [vmem:[#allocation6 + $0x60] sm:$0xff]  ;;  %v375_v22 = vld [vmem:[#allocation6 + $0xc8] sm:$0xff] }
  0xbf   :  { %388 = vmatpush.msrb.mxu2 %v375_v22 }
  0xc0   :  { %v201_v25 = vadd.f32 %v200_v24, %v199_v21  ;;  %v209_v26 = vrot.slane %v208_v23, 4  ;;  %v443_v21 = vld [vmem:[#allocation6 + $0x160] sm:$0xff]  ;;  %v442_v24 = vld [vmem:[#allocation6 + $0x158] sm:$0xff] }
  0xc1   :  { %450 = vmatpush.msra.mxu1 %v443_v21 }
  0xc2   :  { %v202_v28 = vrot.slane %v201_v25, 2  ;;  %v210_v30 = vadd.f32 %v209_v26, %v208_v23  ;;  %v358_v23 = vld [vmem:[#allocation6 + $0x58] sm:$0xff]  ;;  %v357_v26 = vld [vmem:[#allocation6 + $0x50] sm:$0xff] }
  0xc3   :  { %451 = vmatpush.msra.mxu1 %v442_v24 }
  0xc4   :  { %v203_v31 = vadd.f32 %v202_v28, %v201_v25  ;;  %v211_v33 = vrot.slane %v210_v30, 2  ;;  %v374_v25 = vld [vmem:[#allocation6 + $0xc0] sm:$0xff]  ;;  %v441_v28 = vld [vmem:[#allocation6 + $0x150] sm:$0xff] }
  0xc5   :  { %389 = vmatpush.msrb.mxu2 %v374_v25  ;;  %452 = vmatpush.msra.mxu1 %v441_v28 }
  0xc6   :  { %v204_v34 = vrot.slane %v203_v31, 1  ;;  %v212_v35 = vadd.f32 %v211_v33, %v210_v30  ;;  %v373_v30 = vld [vmem:[#allocation6 + $0xb8] sm:$0xff]  ;;  %v440_v33 = vld [vmem:[#allocation6 + $0x148] sm:$0xff] }
  0xc7   :  { %390 = vmatpush.msrb.mxu2 %v373_v30  ;;  %453 = vmatpush.msra.mxu1 %v440_v33 }
  0xc8   :  { %v205_v36 = vadd.f32 %v204_v34, %v203_v31  ;;  %v213_v37 = vrot.slane %v212_v35, 1  ;;  %v356_v31 = vld [vmem:[#allocation6 + $0x48] sm:$0xff]  ;;  %v372_v34 = vld [vmem:[#allocation6 + $0xb0] sm:$0xff] }
  0xc9   :  { %391 = vmatpush.msrb.mxu2 %v372_v34 }
  0xca   :  { %247 = vmatmul.f32.vlgmr.msra.gmra.mxu3 %v205_v36  ;;  %v214_v38 = vadd.f32 %v213_v37, %v212_v35  ;;  %v355_v35 = vld [vmem:[#allocation6 + $0x40] sm:$0xff]  ;;  %v371_v37 = vld [vmem:[#allocation6 + $0xa8] sm:$0xff] }
  0xcb   :  { %405 = vmatpush.msra.mxu3 %v362_v10  ;;  %v439_v36 = vld [vmem:[#allocation6 + $0x140] sm:$0xff]  ;;  %392 = vmatpush.msrb.mxu2 %v371_v37 }
  0xcc   :  { %268 = vmatmul.f32.vlgmr.msrb.gmra.mxu0 %v214_v38  ;;  %454 = vmatpush.msra.mxu1 %v439_v36  ;;  %v370_v38 = vld [vmem:[#allocation6 + $0xa0] sm:$0xff] }
  0xcd   :  { %406 = vmatpush.msra.mxu3 %v361_v12  ;;  %393 = vmatpush.msrb.mxu2 %v370_v38  ;;  %v431_v10 = vld [vmem:[#allocation6 + $0x100] sm:$0xff] }
  0xcf   :  { %407 = vmatpush.msra.mxu3 %v360_v14 }
  0xd1   :  { %408 = vmatpush.msra.mxu3 %v359_v20 }
  0xd3   :  { %409 = vmatpush.msra.mxu3 %v358_v23 }
  0xd5   :  { %410 = vmatpush.msra.mxu3 %v357_v26 }
  0xd7   :  { %411 = vmatpush.msra.mxu3 %v356_v31 }
  0xd9   :  { %412 = vmatpush.msra.mxu3 %v355_v35 }
 0x149   :  { %v269_v40 = vpop.f32.mrf.mxu0 }
 0x14a   :  { %v272_v43 = vmul.f32 0.00390625, %v269_v40  ;;  %v354_v40 = vld [vmem:[#allocation6 + $0x38] sm:$0xff] }
 0x14b   :  { %413 = vmatpush.msra.mxu3 %v354_v40 }
 0x14d   :  { %v248_v41 = vpop.f32.mrf.mxu3 }
 0x14e   :  { %v251_v42 = vmul.f32 0.00390625, %v248_v41  ;;  %v438_v41 = vld [vmem:[#allocation6 + $0x138] sm:$0xff] }
 0x14f   :  { %455 = vmatpush.msra.mxu1 %v438_v41 }
 0x150   :  { %v273_v44 = vmul.f32 %v251_v42, %v251_v42  ;;  %645 = vmatmul.msk.f32.vlgmr.msrb.gmra.mxu3 %vm288_vm0, %v251_v42  ;;  %v369_v42 = vld [vmem:[#allocation6 + $0x98] sm:$0xff] }
 0x151   :  { %394 = vmatpush.msrb.mxu2 %v369_v42 }
 0x152   :  { %v274_v45 = vsub.f32 %v272_v43, %v273_v44  ;;  %v353_v43 = vld [vmem:[#allocation6 + $0x30] sm:$0xff] }
 0x153   :  { %v437_v44 = vld [vmem:[#allocation6 + $0x130] sm:$0xff]  ;;  %414 = vmatpush.msra.mxu3 %v353_v43 }
 0x154   :  { %v275_v46 = vmax.f32 %v274_v45, 0.0  ;;  %456 = vmatpush.msra.mxu1 %v437_v44  ;;  %v368_v45 = vld [vmem:[#allocation6 + $0x90] sm:$0xff] }
 0x155   :  { %395 = vmatpush.msrb.mxu2 %v368_v45 }
 0x156   :  { %v276_v47 = vadd.f32 1e-05, %v275_v46  ;;  %v352_v46 = vld [vmem:[#allocation6 + $0x28] sm:$0xff] }
 0x157   :  { %415 = vmatpush.msra.mxu3 %v352_v46 }
 0x158   :  { %657 = vrsqrt.f32 %v276_v47  ;;  %vm283_vm2 = vweird.f32 %v276_v47 }
 0x15e   :  { %v658_v48 = vpop.eup %657 }
 0x15f   :  { %v278_v49 = vmul.f32 %v658_v48, %v276_v47  ;;  %vm284_vm1 = vweird.f32 %v658_v48  ;;  %v436_v47 = vld [vmem:[#allocation6 + $0x128] sm:$0xff] }
 0x160   :  { %vm285_vm3 = vmor %vm283_vm2, %vm284_vm1  ;;  %457 = vmatpush.msra.mxu1 %v436_v47 }
 0x161   :  { %v279_v50 = vmul.f32 %v658_v48, %v278_v49  ;;  %v351_v49 = vld [vmem:[#allocation6 + $0x20] sm:$0xff] }
 0x162   :  { %416 = vmatpush.msra.mxu3 %v351_v49 }
 0x163   :  { %v280_v51 = vmul.f32 0.5, %v279_v50  ;;  %v435_v50 = vld [vmem:[#allocation6 + $0x120] sm:$0xff] }
 0x164   :  { %458 = vmatpush.msra.mxu1 %v435_v50 }
 0x165   :  { %v281_v52 = vsub.f32 1.5, %v280_v51  ;;  %v366_v51 = vld [vmem:[#allocation6 + $0x80] sm:$0xff] }
 0x167   :  { %v282_v53 = vmul.f32 %v658_v48, %v281_v52  ;;  %v350_v52 = vld [vmem:[#allocation6 + $0x18] sm:$0xff] }
 0x168   :  { %417 = vmatpush.msra.mxu3 %v350_v52 }
 0x169   :  { %v286_v54 = vsel %vm285_vm3, %v658_v48, %v282_v53  ;;  %v367_v48 = vld [vmem:[#allocation6 + $0x88] sm:$0xff]  ;;  %v434_v53 = vld [vmem:[#allocation6 + $0x118] sm:$0xff] }
 0x16a   :  { %646 = vmatmul.msk.f32.vlgmr.msrb.gmra.mxu1 %vm288_vm0, %v286_v54  ;;  %v349_v54 = vld [vmem:[#allocation6 + $0x10] sm:$0xff]  ;;  %396 = vmatpush.msrb.mxu2 %v367_v48 }
 0x16b   :  { %459 = vmatpush.msra.mxu1 %v434_v53  ;;  %418 = vmatpush.msra.mxu3 %v349_v54 }
 0x16c   :  { %397 = vmatpush.msrb.mxu2 %v366_v51 }
 0x16d   :  { %460 = vmatpush.msra.mxu1 %v433_v55  ;;  %419 = vmatpush.msra.mxu3 %v348_v7 }
 0x16e   :  { %531 = vmatpush.msra.mxu2 %v812_v32 }
 0x16f   :  { %461 = vmatpush.msra.mxu1 %v432_v8  ;;  %420 = vmatpush.msra.mxu3 %v347_v9 }
 0x170   :  { %532 = vmatpush.msra.mxu2 %v821_v56 }
 0x171   :  { %462 = vmatpush.msra.mxu1 %v431_v10  ;;  %585 = vmatpush.msrb.mxu3 %v955_v39 }
 0x172   :  { %533 = vmatpush.msra.mxu2 %v828_v57 }
 0x173   :  { %608 = vmatpush.msrb.mxu1 %v955_v39 }
 0x174   :  { %534 = vmatpush.msra.mxu2 %v835_v58 }
 0x176   :  { %535 = vmatpush.msra.mxu2 %v842_v59 }
 0x178   :  { %536 = vmatpush.msra.mxu2 %v849_v60 }
 0x17a   :  { %537 = vmatpush.msra.mxu2 %v856_v61 }
 0x17c   :  { %538 = vmatpush.msra.mxu2 %v863_v62 }
 0x17e   :  { %539 = vmatpush.msra.mxu2 %v870_v63 }
 0x180   :  { %540 = vmatpush.msra.mxu2 %v877_v0 }
 0x182   :  { %541 = vmatpush.msra.mxu2 %v884_v1 }
 0x184   :  { %542 = vmatpush.msra.mxu2 %v889_v2 }
 0x186   :  { %543 = vmatpush.msra.mxu2 %v896_v3 }
 0x188   :  { %544 = vmatpush.msra.mxu2 %v903_v4 }
 0x18a   :  { %545 = vmatpush.msra.mxu2 %v910_v5  ;;  %v656_v5 = vld [vmem:[%s998_s4] ss:$0 sm:$0xff]  ;;  %s744_s4 = smov [#allocation8]  }
 0x18b   :  { %s629_s25 = sshll.u32 %s744_s4, 4  ;;  %s630_s25 = int_to_ptr.vmem [resolvable:$true] %s629_s25 }
 0x18c   :  { %546 = vmatpush.msra.mxu2 %v917_v6 }
 0x1d3   :  { %v309_v32 = vpop.f32.mrf.mxu3 }
 0x1d4   :  { %v335_v56 = vperm.slane %v309_v32, 0 }
 0x1d6   :  { %v336_v39 = vsub.f32 %v933_v17, %v335_v56  ;;  %v337_v58 = vsub.f32 %v936_v19, %v335_v56 }
 0x1e7   :  { %v332_v57 = vpop.f32.mrf.mxu1 }
 0x1e8   :  { %v338_v59 = vperm.slane %v332_v57, 0 }
 0x1ea   :  { %v339_v60 = vmul.f32 %v338_v59, %v336_v39  ;;  %v340_v61 = vmul.f32 %v338_v59, %v337_v58 }
 0x1ec   :  { %v341_v62 = vmax.f32 %v339_v60, 0.0  ;;  %v342_v11 = vmax.f32 %v340_v61, 0.0 }
 0x1ee   :  { %343 = vst [vmem:[#allocation2 + $0x1] sm:$0xff] %v341_v62  ;;  %398 = vmatmul.f32.vlgmr.msrb.gmra.mxu2 %v341_v62 }
 0x1ef   :  { %344 = vst [vmem:[#allocation2 + $0x9] sm:$0xff] %v342_v11 }
 0x1f5   :  { %v345_v63 = vld [vmem:[#allocation2] sm:$0xff] }
 0x1f6   :  { %421 = vmatmul.f32.vlgmr.msra.gmra.mxu3 %v345_v63  ;;  %v428_v0 = vld [vmem:[#allocation2 + $0x2] sm:$0xff]  ;;  %401 = vmatmul.f32.gmra.mxu2 %v342_v11  ;;  %v429_v2 = vld [vmem:[#allocation2 + $0xa] sm:$0xff] }
 0x1f7   :  { %463 = vmatmul.f32.vlgmr.msra.gmra.mxu1 %v428_v0  ;;  %v346_v1 = vld [vmem:[#allocation2 + $0x8] sm:$0xff] }
 0x1fe   :  { %424 = vmatmul.f32.gmra.mxu3 %v346_v1 }
 0x1ff   :  { %466 = vmatmul.f32.gmra.mxu1 %v429_v2 }
 0x271   :  { %v399_v3 = vpop.f32.mrf.mxu2 }
 0x274   :  { %v464_v17 = vpop.f32.mrf.mxu1 }
 0x279   :  { %v422_v19 = vpop.f32.mrf.mxu3  ;;  %v402_v13 = vpop.f32.mrf.mxu2 }
 0x27a   :  { %v423_v4 = vadd.f32 %v422_v19, %v399_v3 }
 0x27c   :  { %v470_v12 = vadd.f32 %v464_v17, %v423_v4  ;;  %v467_v15 = vpop.f32.mrf.mxu1 }
 0x27e   :  { %v476_v16 = vadd.f32 %v656_v5, %v470_v12 }
 0x280   :  { %v485_v21 = vmul.f32 %v476_v16, %v476_v16 }
 0x281   :  { %v425_v6 = vpop.f32.mrf.mxu3 }
 0x282   :  { %v426_v14 = vadd.f32 %v425_v6, %v402_v13 }
 0x284   :  { %v471_v18 = vadd.f32 %v467_v15, %v426_v14 }
 0x286   :  { %v477_v20 = vadd.f32 %v656_v5, %v471_v18 }
 0x288   :  { %v478_v22 = vadd.f32 %v477_v20, %v476_v16  ;;  %v486_v23 = vmul.f32 %v477_v20, %v477_v20 }
 0x28a   :  { %v479_v24 = vrot.slane %v478_v22, 4  ;;  %v487_v25 = vadd.f32 %v486_v23, %v485_v21 }
 0x28c   :  { %v480_v26 = vadd.f32 %v479_v24, %v478_v22  ;;  %v488_v28 = vrot.slane %v487_v25, 4 }
 0x28e   :  { %v481_v30 = vrot.slane %v480_v26, 2  ;;  %v489_v31 = vadd.f32 %v488_v28, %v487_v25 }
 0x290   :  { %v482_v33 = vadd.f32 %v481_v30, %v480_v26  ;;  %v490_v34 = vrot.slane %v489_v31, 2 }
 0x292   :  { %v483_v35 = vrot.slane %v482_v33, 1  ;;  %v491_v36 = vadd.f32 %v490_v34, %v489_v31 }
 0x294   :  { %v484_v37 = vadd.f32 %v483_v35, %v482_v33  ;;  %v492_v38 = vrot.slane %v491_v36, 1 }
 0x296   :  { %526 = vmatmul.f32.vlgmr.msra.gmra.mxu0 %v484_v37  ;;  %v493_v40 = vadd.f32 %v492_v38, %v491_v36 }
 0x298   :  { %547 = vmatmul.f32.vlgmr.msra.gmra.mxu2 %v493_v40 }
 0x313   :  { %v527_v41 = vpop.f32.mrf.mxu0 }
 0x314   :  { %v530_v42 = vmul.f32 0.00390625, %v527_v41 }
 0x316   :  { %647 = vmatmul.msk.f32.vlgmr.msrb.gmra.mxu3 %vm288_vm0, %v530_v42  ;;  %v552_v44 = vmul.f32 %v530_v42, %v530_v42 }
 0x31b   :  { %v548_v43 = vpop.f32.mrf.mxu2 }
 0x31c   :  { %v551_v45 = vmul.f32 0.00390625, %v548_v43 }
 0x31e   :  { %v553_v46 = vsub.f32 %v551_v45, %v552_v44 }
 0x320   :  { %v554_v47 = vmax.f32 %v553_v46, 0.0 }
 0x322   :  { %v555_v48 = vadd.f32 1e-05, %v554_v47 }
 0x324   :  { %659 = vrsqrt.f32 %v555_v48  ;;  %vm562_vm5 = vweird.f32 %v555_v48 }
 0x32a   :  { %v660_v49 = vpop.eup %659 }
 0x32b   :  { %v557_v50 = vmul.f32 %v660_v49, %v555_v48  ;;  %vm563_vm4 = vweird.f32 %v660_v49 }
 0x32c   :  { %vm564_vm6 = vmor %vm562_vm5, %vm563_vm4 }
 0x32d   :  { %v558_v51 = vmul.f32 %v660_v49, %v557_v50 }
 0x32f   :  { %v559_v52 = vmul.f32 0.5, %v558_v51 }
 0x331   :  { %v560_v53 = vsub.f32 1.5, %v559_v52 }
 0x333   :  { %v561_v54 = vmul.f32 %v660_v49, %v560_v53 }
 0x335   :  { %v565_v55 = vsel %vm564_vm6, %v660_v49, %v561_v54 }
 0x336   :  { %648 = vmatmul.msk.f32.vlgmr.msrb.gmra.mxu1 %vm288_vm0, %v565_v55 }
 0x399   :  { %v587_v7 = vpop.f32.mrf.mxu3 }
 0x39a   :  { %v613_v8 = vperm.slane %v587_v7, 0 }
 0x39c   :  { %v614_v10 = vsub.f32 %v476_v16, %v613_v8  ;;  %v615_v32 = vsub.f32 %v477_v20, %v613_v8 }
 0x3b3   :  { %v610_v9 = vpop.f32.mrf.mxu1 }
 0x3b4   :  { %v616_v56 = vperm.slane %v610_v9, 0 }
 0x3b6   :  { %v617_v57 = vmul.f32 %v616_v56, %v614_v10  ;;  %v618_v39 = vmul.f32 %v616_v56, %v615_v32 }
 0x3b8   :  { %v619_v58 = vmax.f32 %v617_v57, 0.0  ;;  %v620_v59 = vmax.f32 %v618_v39, 0.0 }
 0x3ba   :  { %v621_v60 = vadd.f32 %v619_v58, %v800_v27  ;;  %v622_v61 = vadd.f32 %v620_v59, %v805_v29 }
 0x3bc   :  { %623 = vst [vmem:[#allocation8] sm:$0xff] %v621_v60 }
 0x3bd   :  { %624 = vst [vmem:[#allocation8 + $0x8] sm:$0xff] %v622_v61 }
 0x3be   :  { %637 = dma.vmem_to_hbm [thread:$0]  %s630_s25, 256, %s632_s28, [#allocation5], %s740_s9, %s740_s9, %s741_s10  }
 0x3bf   :  { %737 = dma.done.wait [#allocation5], 256  }
 0x3c0   :  { %738 = vsyncadd [#allocation5], 4294967040 }
 0x3c1   :  { %642 = vsyncpa [#allocation4], 1 }
 0x3c2   :  { %643 = vsyncpa [#allocation7], 1 }
 0x3c3   :  { %644 = vsyncpa [#allocation5], 1 }

</bundles_post_ra>
